<compile_context>
chip_gen: v6e
topology: v6e:2x2x1
jax: 0.10.0
libtpu: 0.0.40
codegen_flags: <defaults>
</compile_context>

<pallas_src>
import jax
import jax.numpy as jnp
from jax.experimental import pallas as pl
from jax.experimental.pallas import tpu as pltpu


def _round_up(v, m):
    return ((v + m - 1) // m) * m


def _merge_runs(shape, dims):
    """Merge runs of input axes that stay contiguous & in-order in the output.

    Returns (merged_input_shape, merged_perm) such that
      x.reshape(merged_input_shape).transpose(merged_perm)
    equals x.transpose(dims) up to a final reshape to the permuted shape.
    """
    groups = [[dims[0]]]
    for d in dims[1:]:
        if d == groups[-1][-1] + 1:
            groups[-1].append(d)
        else:
            groups.append([d])
    # `groups` is in output order; sort by first input axis to get input order.
    order = sorted(range(len(groups)), key=lambda g: groups[g][0])
    merged_in_shape = []
    for g in order:
        size = 1
        for ax in groups[g]:
            size *= shape[ax]
        merged_in_shape.append(size)
    pos_of_group = {g: p for p, g in enumerate(order)}  # group -> merged input axis
    merged_perm = tuple(pos_of_group[g] for g in range(len(groups)))
    return tuple(merged_in_shape), merged_perm


def _transpose_kernel(x_ref, o_ref):
    # x_ref: (1, TM, TN) -> o_ref: (1, TN, TM); minor-two-dim transpose on the XLU.
    o_ref[...] = jnp.transpose(x_ref[...], (0, 2, 1))


def _batched_transpose(x3, *, tile=512):
    """(B, M, N) -> (B, N, M) via a tiled Pallas kernel."""
    B, M, N = x3.shape
    itemsize = jnp.dtype(x3.dtype).itemsize

    # Large tiles (up to 512x512, a multiple of 128 so both the input and the
    # transposed output block satisfy the (8,128) rules); dims smaller than the
    # tile are taken whole, padded up to a sublane multiple so the in-kernel
    # transpose stays aligned.  Partial edge blocks are handled by pl.cdiv:
    # OOB reads only ever land in OOB (discarded) output positions.
    if M > tile:
        TM, Mp = tile, M
    else:
        Mp = _round_up(max(M, 1), 8)
        TM = Mp
    if N > tile:
        TN, Np = tile, N
    else:
        Np = _round_up(max(N, 1), 8)
        TN = Np

    if (Mp, Np) != (M, N):
        x3 = jnp.pad(x3, ((0, 0), (0, Mp - M), (0, Np - N)))

    grid = (B, pl.cdiv(Mp, TM), pl.cdiv(Np, TN))
    blk_bytes = TM * TN * itemsize

    out = pl.pallas_call(
        _transpose_kernel,
        out_shape=jax.ShapeDtypeStruct((B, Np, Mp), x3.dtype),
        grid_spec=pltpu.PrefetchScalarGridSpec(
            num_scalar_prefetch=0,
            grid=grid,
            in_specs=[pl.BlockSpec((1, TM, TN), lambda b, i, j: (b, i, j))],
            out_specs=pl.BlockSpec((1, TN, TM), lambda b, i, j: (b, j, i)),
        ),
        compiler_params=pltpu.CompilerParams(
            # Pure data movement, every block written exactly once -> all axes
            # parallel (lets v7x shard the grid across both TensorCores).
            dimension_semantics=("parallel", "parallel", "parallel"),
            # in + out blocks double-buffered plus headroom; safe on the
            # 16 MiB (v5e) / 32 MiB (v6e, v7x) default scoped limits.
            vmem_limit_bytes=max(16 * 1024 * 1024, 8 * blk_bytes),
        ),
        cost_estimate=pl.CostEstimate(
            flops=0,
            transcendentals=0,
            bytes_accessed=2 * B * Mp * Np * itemsize,
        ),
    )(x3)

    if (Mp, Np) != (M, N):
        out = out[:, :N, :M]
    return out


def permute_pallas(x, dims, *, tile=512):
    """Equivalent of torch.Tensor.permute(*dims) (== Permute(*dims).forward)."""
    ndim = x.ndim
    if ndim == 0:
        return x
    dims = tuple(int(d) % ndim for d in dims)
    assert sorted(dims) == list(range(ndim)), f"invalid permutation {dims}"
    out_shape = tuple(x.shape[d] for d in dims)

    merged_shape, merged_perm = _merge_runs(x.shape, dims)
    if len(merged_perm) <= 1:                       # identity permutation
        return x
    if merged_perm == (1, 0):                       # plain 2-D transpose
        y = _batched_transpose(x.reshape((1,) + merged_shape), tile=tile)
        return y.reshape(out_shape)
    if merged_perm == (0, 2, 1):                    # batched last-two transpose
        y = _batched_transpose(x.reshape(merged_shape), tile=tile)
        return y.reshape(out_shape)
    # TODO(synk): permutations that do not reduce to a batched minor-dim transpose
    # (e.g. (0,2,1,3)) are not lowered to Pallas here; fall back to XLA transpose.
    return jnp.transpose(x, dims)


if __name__ == "__main__":
    key = jax.random.PRNGKey(0)
    k1, k2 = jax.random.split(key)

    # Permute(0, 2, 3, 1): NCHW -> NHWC  (merges to a (2, 8, 256) batched transpose).
    x = jax.random.normal(k1, (2, 8, 16, 16), jnp.float32)
    dims = (0, 2, 3, 1)
    out = jax.block_until_ready(permute_pallas(x, dims))
    ref = jnp.transpose(x, dims)
    assert out.shape == ref.shape
    assert bool(jnp.array_equal(out, ref)), "mismatch vs reference (NCHW->NHWC)"

    # Permute(0, 2, 1): (B, L, C) -> (B, C, L).
    x2 = jax.random.normal(k2, (2, 128, 256), jnp.float32)
    out2 = jax.block_until_ready(permute_pallas(x2, (0, 2, 1)))
    assert bool(jnp.array_equal(out2, jnp.transpose(x2, (0, 2, 1)))), \
        "mismatch vs reference (0,2,1)"

    print("KERNEL_OK")
</pallas_src>

<mosaic_0001>
module attributes {stable_mosaic.version = 11 : i64} {
  func.func @_transpose_kernel(%arg0: i32, %arg1: i32, %arg2: i32, %arg3: memref<1x8x256xf32, #tpu.memory_space<vmem>>, %arg4: memref<1x256x8xf32, #tpu.memory_space<vmem>>) attributes {dimension_semantics = [#tpu.dimension_semantics<parallel>, #tpu.dimension_semantics<parallel>, #tpu.dimension_semantics<parallel>], iteration_bounds = array<i64: 2, 1, 1>, scalar_prefetch = 0 : i64, scratch_operands = 0 : i64, tpu.core_type = #tpu.core_type<tc>, window_params = [{transform_indices = @transform_0, window_bounds = array<i64: 1, 8, 256>}, {transform_indices = @transform_1, window_bounds = array<i64: 1, 256, 8>}]} {
    %c0 = arith.constant 0 : index
    %c0_0 = arith.constant 0 : index
    %c0_1 = arith.constant 0 : index
    %0 = vector.load %arg3[%c0, %c0_0, %c0_1] : memref<1x8x256xf32, #tpu.memory_space<vmem>>, vector<1x8x256xf32>
    %1 = tpu.transpose %0, [0, 2, 1] : vector<1x8x256xf32> -> vector<1x256x8xf32>
    %c0_2 = arith.constant 0 : index
    %c0_3 = arith.constant 0 : index
    %c0_4 = arith.constant 0 : index
    %2 = vector.load %arg4[%c0_2, %c0_3, %c0_4] : memref<1x256x8xf32, #tpu.memory_space<vmem>>, vector<1x256x8xf32>
    tpu.vector_store %arg4[%c0_2, %c0_3, %c0_4], %1 {strides = array<i32>} : memref<1x256x8xf32, #tpu.memory_space<vmem>>, vector<1x256x8xf32>,
    return
  }
  func.func @transform_0(%arg0: i32, %arg1: i32, %arg2: i32) -> (i32, i32, i32) {
    %c0_i32 = arith.constant 0 : i32
    return %arg0, %arg1, %arg2 : i32, i32, i32
  }
  func.func @transform_1(%arg0: i32, %arg1: i32, %arg2: i32) -> (i32, i32, i32) {
    %c0_i32 = arith.constant 0 : i32
    return %arg0, %arg2, %arg1 : i32, i32, i32
  }
}

</mosaic_0001>

<bundles_post_ra>
// kernel: tpu_custom_call.1
= control target key start
LH: loop header
LB: loop body
LE: loop exit
PB: predicated region body
PF: predicated region fallthrough
CT: control target
= control target key end

     0   :  { %6 = vsyncpa [#allocation3], 0  ;;  %s719_s0 = inlined_call_operand.hbm [shape: f32[2,8,256], index: 0, kind: input, shape index: {}]   ;;  %s720_s1 = inlined_call_operand.vmem [shape: f32[2,256,8], index: 1, kind: output, shape index: {}]  }
   0x1   :  { %8 = vsyncpa [#allocation3 + $0x1], 0  ;;  %s553_s6 = smov 0   ;;  %s555_s7 = smov 0  }
   0x2   :  { %s557_s8 = smov 0   ;;  %s559_s9 = smov 0  }
   0x3   :  { %s561_s10 = smov 0   ;;  %s563_s11 = smov 0  }
   0x4 LB: > { %s391_s12 = sadd.s32 4294967295, %s540_s11   ;;  %s33_s13 = sadd.s32 1, %s536_s10  ;;  %s540_s11 = sphi %s563_s11, %s14_s11   ;;  %s536_s10 = sphi %s561_s10, %s728_s10   ;;  %s532_s9 = sphi %s559_s9, %s727_s9   ;;  %s528_s8 = sphi %s557_s8, %s726_s8   ;;  %s524_s7 = sphi %s555_s7, %s725_s7   ;;  %s520_s6 = sphi %s553_s6, %s724_s6  }
   0x5   : > { %p35_p0 = scmp.ge.s32.totalorder %s33_s13, 2  ;;  %s44_s14 = sadd.s32 1, %s528_s8 }
   0x6   : > { %p51_p1 = scmp.ne.s32.totalorder %s528_s8, %s524_s7  ;;  %p52_p2 = scmp.eq.s32.totalorder %s540_s11, 0 }
   0x7   : > { %s730_s13 = smov (%p35_p0, %s33_s13), 0  ;;  %p57_p4 = scmp.ne.s32.totalorder %s524_s7, %s520_s6 }
   0x8   : > { %p589_p3 = por %p52_p2, %p51_p1  ;;  %s37_s16 = ssub.s32 %s536_s10, %s730_s13 }
   0x9   : > { %p58_p5 = scmp.eq.s32.totalorder %s391_s12, 0  ;;  %p42_p6 = scmp.eq.s32.totalorder %s37_s16, 0 }
   0xa   : > { %p412_p8 = scmp.lt.s32.totalorder %s540_s11, 2  ;;  %s111_s19 = sand.u32 1, %s528_s8  }
   0xb   : > { %p596_p7 = por %p58_p5, %p57_p4  ;;  %s404_s20 = sshll.u32 %s536_s10, 8 }
   0xc   : > { %s602_s18 = scalar_select %p42_p6, %s528_s8, %s44_s14  }
   0xd   : > { %s395_s21 = sshll.u32 %s111_s19, 4  ;;  %s125_s24 = scalar_lea.hbm %s719_s0, %s404_s20 }
   0xe   : > { %s115_s25 = scalar_lea.vmem [#allocation2], %s395_s21  ;;  %p611_p9 = pnand %p412_p8, %p589_p3 }
   0xf   : > { %s127_s26 = sshll.u32 %s115_s25, 4  ;;  %p398_p10 = scmp.ge.s32.totalorder %s540_s11, 1  ;;  %s128_s26 = int_to_ptr.vmem [resolvable:$true] %s127_s26 }
  0x10   : > { %p132_p11 = scmp.lt.s32.totalorder %s540_s11, 3  ;;  %s112_s28 = scalar_lea.sflag [#allocation3], %s111_s19 }
  0x11   : > { %p464_p12 = pneg %p611_p9  ;;  %s475_s29 = scalar_lea.vmem %s128_s26, 256 }
  0x12   : > { %p476_p13 = scmp.ne.s32.totalorder %s128_s26, %s475_s29  ;;  %s542_s30 = smov [#allocation2]  }
  0x13   : > { %s480_s2 = sshll.u32 %s542_s30, 4  ;;  %s481_s2 = int_to_ptr.vmem [resolvable:$false] %s480_s2 }
  0x14   : > { %p478_p0 = pnand %p476_p13, %p464_p12  ;;  %s482_s3 = scalar_lea.vmem %s481_s2, 512 }
  0x15   : > { %p483_p2 = scmp.lt.s32.totalorder %s128_s26, %s481_s2  ;;  %p484_p3 = scmp.lt.s32.totalorder %s482_s3, %s475_s29 }
  0x16   : > { %p479_p1 = pneg %p478_p0 }
  0x17   : > { %p485_p4 = por %p484_p3, %p483_p2 }
  0x19   : > { %p486_p5 = pnand %p485_p4, %p479_p1 }
  0x1b   : > { %489 = shalt.err (!%p486_p5)
}
  0x1c   : > { %411 = dma.hbm_to_vmem [thread:$0]  (!%p611_p9), %s125_s24, 256, %s128_s26, %s112_s28  }
  0x1d   : > { %p133_p6 = pnand %p398_p10, %p132_p11 }
  0x1e   : > { %s138_s4 = sand.u32 (!%p133_p6), 1, %s524_s7  }
  0x1f   : > { %136 = sbr.rel (%p133_p6) target bundleno = 288 (0x120), region = 24  ;;  %s399_s5 = sshll.u32 (!%p133_p6), %s138_s4, 4 }
  0x20   : > { %s139_s6 = scalar_lea.sflag (!%p133_p6), [#allocation3], %s138_s4  ;;  %s142_s12 = scalar_lea.vmem (!%p133_p6), [#allocation2], %s399_s5 }
  0x24   : > { %515 = dma.done.wait (%p596_p7), %s139_s6, 256  }
  0x25   : > { %517 = vsyncadd (%p596_p7), %s139_s6, 4294967040  ;;  %v182_v0 = vld [vmem:[%s142_s12] sm:$0xff]  ;;  %v183_v1 = vld [vmem:[%s142_s12 + $0x8] sm:$0xff]  ;;  %p170_p8 = scmp.lt.s32.totalorder %s532_s9, 1  ;;  %vm248_vm0 = vcmask 64512  }
  0x26   : > { %184 = vxpose.xlu0.b32.start.end [1/1] (short) %v182_v0, 128 }
  0x27   : > { %s732_s9 = smov (!%p170_p8, %s532_s9), 1 }
  0x28   : > { %s405_s14 = sshll.u32 %s732_s9, 8 }
  0x29   : > { %s635_s19 = scalar_lea.vmem %s720_s1, %s405_s14 }
  0x63   : > { %216 = vxpose.xlu0.b32.start.end [1/1] (short) %v183_v1, 128 }
  0xa2   : > { %v200_v2 = vpop.trf.xlu0 }
  0xa3   : > { %249 = vst.msk [vmem:[%s635_s19] sm:$0xff] %vm248_vm0, %v200_v2 }
  0xa6   : > { %v201_v3 = vpop.trf.xlu0 }
  0xa7   : > { %250 = vst.msk [vmem:[%s635_s19 + $0x8] sm:$0xff] %vm248_vm0, %v201_v3 }
  0xaa   : > { %v202_v4 = vpop.trf.xlu0 }
  0xab   : > { %251 = vst.msk [vmem:[%s635_s19 + $0x10] sm:$0xff] %vm248_vm0, %v202_v4 }
  0xae   : > { %v203_v5 = vpop.trf.xlu0 }
  0xaf   : > { %252 = vst.msk [vmem:[%s635_s19 + $0x18] sm:$0xff] %vm248_vm0, %v203_v5 }
  0xb2   : > { %v204_v6 = vpop.trf.xlu0 }
  0xb3   : > { %253 = vst.msk [vmem:[%s635_s19 + $0x20] sm:$0xff] %vm248_vm0, %v204_v6 }
  0xb6   : > { %v205_v7 = vpop.trf.xlu0 }
  0xb7   : > { %254 = vst.msk [vmem:[%s635_s19 + $0x28] sm:$0xff] %vm248_vm0, %v205_v7 }
  0xba   : > { %v206_v8 = vpop.trf.xlu0 }
  0xbb   : > { %255 = vst.msk [vmem:[%s635_s19 + $0x30] sm:$0xff] %vm248_vm0, %v206_v8 }
  0xbe   : > { %v207_v9 = vpop.trf.xlu0 }
  0xbf   : > { %256 = vst.msk [vmem:[%s635_s19 + $0x38] sm:$0xff] %vm248_vm0, %v207_v9 }
  0xc2   : > { %v208_v10 = vpop.trf.xlu0 }
  0xc3   : > { %257 = vst.msk [vmem:[%s635_s19 + $0x40] sm:$0xff] %vm248_vm0, %v208_v10 }
  0xc6   : > { %v209_v11 = vpop.trf.xlu0 }
  0xc7   : > { %258 = vst.msk [vmem:[%s635_s19 + $0x48] sm:$0xff] %vm248_vm0, %v209_v11 }
  0xca   : > { %v210_v12 = vpop.trf.xlu0 }
  0xcb   : > { %259 = vst.msk [vmem:[%s635_s19 + $0x50] sm:$0xff] %vm248_vm0, %v210_v12 }
  0xce   : > { %v211_v13 = vpop.trf.xlu0 }
  0xcf   : > { %260 = vst.msk [vmem:[%s635_s19 + $0x58] sm:$0xff] %vm248_vm0, %v211_v13 }
  0xd2   : > { %v212_v14 = vpop.trf.xlu0 }
  0xd3   : > { %261 = vst.msk [vmem:[%s635_s19 + $0x60] sm:$0xff] %vm248_vm0, %v212_v14 }
  0xd6   : > { %v213_v15 = vpop.trf.xlu0 }
  0xd7   : > { %262 = vst.msk [vmem:[%s635_s19 + $0x68] sm:$0xff] %vm248_vm0, %v213_v15 }
  0xda   : > { %v214_v16 = vpop.trf.xlu0 }
  0xdb   : > { %263 = vst.msk [vmem:[%s635_s19 + $0x70] sm:$0xff] %vm248_vm0, %v214_v16 }
  0xde   : > { %v215_v17 = vpop.trf.xlu0 }
  0xdf   : > { %264 = vst.msk [vmem:[%s635_s19 + $0x78] sm:$0xff] %vm248_vm0, %v215_v17 }
  0xe2   : > { %v232_v18 = vpop.trf.xlu0 }
  0xe3   : > { %265 = vst.msk [vmem:[%s635_s19 + $0x80] sm:$0xff] %vm248_vm0, %v232_v18 }
  0xe6   : > { %v233_v19 = vpop.trf.xlu0 }
  0xe7   : > { %266 = vst.msk [vmem:[%s635_s19 + $0x88] sm:$0xff] %vm248_vm0, %v233_v19 }
  0xea   : > { %v234_v20 = vpop.trf.xlu0 }
  0xeb   : > { %267 = vst.msk [vmem:[%s635_s19 + $0x90] sm:$0xff] %vm248_vm0, %v234_v20 }
  0xee   : > { %v235_v21 = vpop.trf.xlu0 }
  0xef   : > { %268 = vst.msk [vmem:[%s635_s19 + $0x98] sm:$0xff] %vm248_vm0, %v235_v21 }
  0xf2   : > { %v236_v22 = vpop.trf.xlu0 }
  0xf3   : > { %269 = vst.msk [vmem:[%s635_s19 + $0xa0] sm:$0xff] %vm248_vm0, %v236_v22 }
  0xf6   : > { %v237_v23 = vpop.trf.xlu0 }
  0xf7   : > { %270 = vst.msk [vmem:[%s635_s19 + $0xa8] sm:$0xff] %vm248_vm0, %v237_v23 }
  0xfa   : > { %v238_v24 = vpop.trf.xlu0 }
  0xfb   : > { %271 = vst.msk [vmem:[%s635_s19 + $0xb0] sm:$0xff] %vm248_vm0, %v238_v24 }
  0xfe   : > { %v239_v25 = vpop.trf.xlu0 }
  0xff   : > { %272 = vst.msk [vmem:[%s635_s19 + $0xb8] sm:$0xff] %vm248_vm0, %v239_v25 }
 0x102   : > { %v240_v26 = vpop.trf.xlu0 }
 0x103   : > { %273 = vst.msk [vmem:[%s635_s19 + $0xc0] sm:$0xff] %vm248_vm0, %v240_v26 }
 0x106   : > { %v241_v27 = vpop.trf.xlu0 }
 0x107   : > { %274 = vst.msk [vmem:[%s635_s19 + $0xc8] sm:$0xff] %vm248_vm0, %v241_v27 }
 0x10a   : > { %v242_v28 = vpop.trf.xlu0 }
 0x10b   : > { %275 = vst.msk [vmem:[%s635_s19 + $0xd0] sm:$0xff] %vm248_vm0, %v242_v28 }
 0x10e   : > { %v243_v29 = vpop.trf.xlu0 }
 0x10f   : > { %276 = vst.msk [vmem:[%s635_s19 + $0xd8] sm:$0xff] %vm248_vm0, %v243_v29 }
 0x112   : > { %v244_v30 = vpop.trf.xlu0 }
 0x113   : > { %277 = vst.msk [vmem:[%s635_s19 + $0xe0] sm:$0xff] %vm248_vm0, %v244_v30 }
 0x116   : > { %v245_v31 = vpop.trf.xlu0 }
 0x117   : > { %278 = vst.msk [vmem:[%s635_s19 + $0xe8] sm:$0xff] %vm248_vm0, %v245_v31 }
 0x11a   : > { %v246_v32 = vpop.trf.xlu0 }
 0x11b   : > { %279 = vst.msk [vmem:[%s635_s19 + $0xf0] sm:$0xff] %vm248_vm0, %v246_v32 }
 0x11e   : > { %v247_v33 = vpop.trf.xlu0 }
 0x11f   : > { %280 = vst.msk [vmem:[%s635_s19 + $0xf8] sm:$0xff] %vm248_vm0, %v247_v33 }
 0x120 PF: > { %s14_s11 = sadd.s32 1, %s540_s11   ;;  %s724_s6 = smov %s524_s7 }
 0x121   : > { %p11_p7 = scmp.ge.s32.totalorder %s14_s11, 4   ;;  %s725_s7 = smov %s528_s8 }
 0x122   : > { %s726_s8 = smov %s602_s18  ;;  %s727_s9 = smov %s536_s10 }
 0x123   : > { %s728_s10 = smov %s730_s13  ;;  %13 = sbr.rel (!%p11_p7) target bundleno = 4 (0x4), region = 64 }
 0x128   :  { %317 = vsyncpa [#allocation3], 1 }
 0x129   :  { %319 = vsyncpa [#allocation3 + $0x1], 1 }

</bundles_post_ra>
